<compile_context>
chip_gen: v5e
topology: v5e:2x2
jax: 0.10.0
libtpu: 0.0.40
codegen_flags: <defaults>
</compile_context>

<pallas_src>
import functools

import jax
import jax.numpy as jnp
from jax.experimental import pallas as pl
from jax.experimental.pallas import tpu as pltpu


def _round_up(n, m):
    return ((n + m - 1) // m) * m


def _device_kind():
    try:
        return jax.devices()[0].device_kind.lower()
    except Exception:
        return ""


def _bf16_epilogue_default():
    # bf16 VPU/EUP path exists on v6e / v7x; v5e (and older) is f32-only.
    k = _device_kind()
    return ("v6" in k) or ("v7" in k) or ("7x" in k)


def _num_tensorcores():
    # v7x has 2 TensorCores per chip; v5e/v6e have 1.
    k = _device_kind()
    return 2 if (("v7" in k) or ("7x" in k)) else 1


def mlp_kernel(x_ref, w1_ref, b1_ref, w2_ref, b2_ref, o_ref, *, bf16_epilogue):
    # fc1: (tb, D_in) @ (D_in, H) on the MXU, f32 accumulation.
    h = jnp.dot(x_ref[...], w1_ref[...], preferred_element_type=jnp.float32)
    h = h + b1_ref[...]
    if bf16_epilogue:
        # v6e/v7x: bf16 EUP tanh (halves vreg pressure, ~2x EUP throughput);
        # h is truncated to bf16 before fc2 anyway, so numerically free.
        h = jnp.tanh(h.astype(jnp.bfloat16))
    else:
        # v5e: keep the f32 VPU/EUP path (no bf16 units).
        h = jnp.tanh(h)
    # fc2: (tb, H) @ (H, Np) on the MXU, f32 accumulation. Np is padded to
    # 128 wrapper-side so the store below is a full-lane (unmasked) vst.
    out = jnp.dot(h.astype(w2_ref.dtype), w2_ref[...],
                  preferred_element_type=jnp.float32)
    o_ref[...] = (out + b2_ref[...]).astype(o_ref.dtype)


def mlp_forward(x, w1, b1, w2, b2, *, block_b=4096, use_bf16=True,
                bf16_epilogue=None, min_pallas_batch=64):
    """x: (B, D_in); w1: (D_in, H); b1: (H,)/(1,H); w2: (H, C); b2: (C,)/(1,C)."""
    B, D_in = x.shape
    H = w1.shape[1]
    C = w2.shape[1]
    out_dtype = x.dtype

    b1 = jnp.asarray(b1, jnp.float32).reshape(1, H)
    b2 = jnp.asarray(b2, jnp.float32).reshape(1, C)

    if bf16_epilogue is None:
        bf16_epilogue = _bf16_epilogue_default()
    bf16_epilogue = bool(use_bf16 and bf16_epilogue)

    # Tiny-batch bypass: a fused XLA dot-tanh-dot beats any kernel here,
    # since the fixed pallas_call overhead dwarfs ~1 MFLOP of compute.
    if B <= min_pallas_batch:
        xd = x.astype(jnp.bfloat16) if use_bf16 else x
        w1d = w1.astype(jnp.bfloat16) if use_bf16 else w1
        w2d = w2.astype(jnp.bfloat16) if use_bf16 else w2
        h = jnp.dot(xd, w1d, preferred_element_type=jnp.float32) + b1
        if bf16_epilogue:
            h = jnp.tanh(h.astype(jnp.bfloat16))
        else:
            h = jnp.tanh(h)
        out = jnp.dot(h.astype(w2d.dtype), w2d,
                      preferred_element_type=jnp.float32) + b2
        return out.astype(out_dtype)

    # bf16 operands for the MXU (v6e/v7x native; fine on v5e), f32 accumulate.
    if use_bf16:
        x = x.astype(jnp.bfloat16)
        w1 = w1.astype(jnp.bfloat16)
        w2 = w2.astype(jnp.bfloat16)

    # Lane-dense output: zero-pad fc2's N dim up to a multiple of 128 so the
    # output store is an unmasked full-lane vst; slice back to C outside.
    Np = max(128, _round_up(C, 128))
    if Np != C:
        w2 = jnp.pad(w2, ((0, 0), (0, Np - C)))
        b2 = jnp.pad(b2, ((0, 0), (0, Np - C)))

    # Batch tile: sublane-aligned, as large as block_b. No batch padding —
    # grid = cdiv(B, tb) and Pallas masks the ragged last tile.
    tb = min(block_b, _round_up(B, 8))
    if _num_tensorcores() > 1 and B > 8:
        # v7x: keep >= 2 grid steps so "parallel" spans both TensorCores.
        tb = min(tb, _round_up(pl.cdiv(B, 2), 8))
    tb = max(tb, 8)
    grid = (pl.cdiv(B, tb),)

    flops = 2.0 * B * D_in * H + 2.0 * B * H * Np
    transcendentals = float(B * H)
    bytes_accessed = (x.size * x.dtype.itemsize
                      + B * Np * jnp.dtype(out_dtype).itemsize
                      + w1.size * w1.dtype.itemsize
                      + w2.size * w2.dtype.itemsize
                      + b1.size * 4 + b2.size * 4)
    cost = pl.CostEstimate(flops=int(flops),
                           transcendentals=int(transcendentals),
                           bytes_accessed=int(bytes_accessed))

    kernel = functools.partial(mlp_kernel, bf16_epilogue=bf16_epilogue)

    out = pl.pallas_call(
        kernel,
        out_shape=jax.ShapeDtypeStruct((B, Np), out_dtype),
        grid=grid,
        in_specs=[
            # Streamed activations: one (tb, D_in) tile per grid step.
            pl.BlockSpec((tb, D_in), lambda i: (i, 0)),
            # Resident parameters: same block for every step (no re-DMA).
            pl.BlockSpec((D_in, H), lambda i: (0, 0)),
            pl.BlockSpec((1, H), lambda i: (0, 0)),
            pl.BlockSpec((H, Np), lambda i: (0, 0)),
            pl.BlockSpec((1, Np), lambda i: (0, 0)),
        ],
        out_specs=pl.BlockSpec((tb, Np), lambda i: (i, 0)),
        compiler_params=pltpu.CompilerParams(
            dimension_semantics=("parallel",)),
        cost_estimate=cost,
    )(x, w1, b1, w2, b2)
    return out[:, :C]


def _reference(x, w1, b1, w2, b2, use_bf16=True, bf16_epilogue=None):
    """Plain-JAX reference applying the same casts the kernel applies."""
    if bf16_epilogue is None:
        bf16_epilogue = _bf16_epilogue_default()
    bf16_epilogue = bool(use_bf16 and bf16_epilogue)
    hi = jax.lax.Precision.HIGHEST
    if use_bf16:
        x = x.astype(jnp.bfloat16).astype(jnp.float32)
        w1 = w1.astype(jnp.bfloat16).astype(jnp.float32)
        w2 = w2.astype(jnp.bfloat16).astype(jnp.float32)
    h = jnp.dot(x, w1, precision=hi) + b1.reshape(1, -1)
    if bf16_epilogue:
        h = jnp.tanh(h.astype(jnp.bfloat16)).astype(jnp.float32)
    else:
        h = jnp.tanh(h)
    if use_bf16:
        h = h.astype(jnp.bfloat16).astype(jnp.float32)
    return jnp.dot(h, w2, precision=hi) + b2.reshape(1, -1)


if __name__ == "__main__":
    # Module config: input_shape[0] = 32 features, hidden = 128, nb_classes = 8.
    B, D_IN, H, C = 8, 32, 128, 8

    key = jax.random.PRNGKey(0)
    kx, kw1, kb1, kw2, kb2, kx2 = jax.random.split(key, 6)

    x = jax.random.normal(kx, (B, D_IN), dtype=jnp.float32)

    # Deterministic synthetic parameters (PyTorch Linear-like uniform init).
    lim1 = 1.0 / jnp.sqrt(D_IN)
    w1 = jax.random.uniform(kw1, (D_IN, H), minval=-lim1, maxval=lim1,
                            dtype=jnp.float32)
    b1 = jax.random.uniform(kb1, (1, H), minval=-lim1, maxval=lim1,
                            dtype=jnp.float32)
    lim2 = 1.0 / jnp.sqrt(H)
    w2 = jax.random.uniform(kw2, (H, C), minval=-lim2, maxval=lim2,
                            dtype=jnp.float32)
    b2 = jax.random.uniform(kb2, (1, C), minval=-lim2, maxval=lim2,
                            dtype=jnp.float32)

    tol = dict(atol=1e-2, rtol=1e-2)

    # 1) Small batch (module-sized), forced through the Pallas kernel:
    #    grid=1, tb=8, lane-dense (tb, 128) store.
    out_small = jax.block_until_ready(
        mlp_forward(x, w1, b1, w2, b2, min_pallas_batch=0))
    ref_small = _reference(x, w1, b1, w2, b2)
    assert out_small.shape == (B, C)
    assert jnp.allclose(out_small, ref_small, **tol)

    # 2) Same small batch via the default dispatch (XLA bypass path).
    out_bypass = jax.block_until_ready(mlp_forward(x, w1, b1, w2, b2))
    assert out_bypass.shape == (B, C)
    assert jnp.allclose(out_bypass, ref_small, **tol)

    # 3) Larger batch: multi-step, weight-resident grid with a ragged last
    #    tile and no batch padding (2000 rows @ tile 512 -> 4 steps).
    Bbig = 2000
    xbig = jax.random.normal(kx2, (Bbig, D_IN), dtype=jnp.float32)
    out_big = jax.block_until_ready(
        mlp_forward(xbig, w1, b1, w2, b2, block_b=512))
    ref_big = _reference(xbig, w1, b1, w2, b2)
    assert out_big.shape == (Bbig, C)
    assert jnp.allclose(out_big, ref_big, **tol)

    print("KERNEL_OK")
</pallas_src>

<mosaic_0001>
module attributes {stable_mosaic.version = 11 : i64} {
  func.func @mlp_kernel(%arg0: i32, %arg1: memref<8x32xbf16, #tpu.memory_space<vmem>>, %arg2: memref<32x128xbf16, #tpu.memory_space<vmem>>, %arg3: memref<1x128xf32, #tpu.memory_space<vmem>>, %arg4: memref<128x128xbf16, #tpu.memory_space<vmem>>, %arg5: memref<1x128xf32, #tpu.memory_space<vmem>>, %arg6: memref<8x128xf32, #tpu.memory_space<vmem>>) attributes {dimension_semantics = [#tpu.dimension_semantics<parallel>], iteration_bounds = array<i64: 1>, scalar_prefetch = 0 : i64, scratch_operands = 0 : i64, tpu.core_type = #tpu.core_type<tc>, window_params = [{transform_indices = @transform_0, window_bounds = array<i64: 8, 32>}, {pipeline_mode = #tpu.pipeline_mode<synchronous>, transform_indices = @transform_1, window_bounds = array<i64: 32, 128>}, {pipeline_mode = #tpu.pipeline_mode<synchronous>, transform_indices = @transform_2, window_bounds = array<i64: 1, 128>}, {pipeline_mode = #tpu.pipeline_mode<synchronous>, transform_indices = @transform_3, window_bounds = array<i64: 128, 128>}, {pipeline_mode = #tpu.pipeline_mode<synchronous>, transform_indices = @transform_4, window_bounds = array<i64: 1, 128>}, {transform_indices = @transform_5, window_bounds = array<i64: 8, 128>}]} {
    %c0 = arith.constant 0 : index
    %c0_0 = arith.constant 0 : index
    %0 = vector.load %arg1[%c0, %c0_0] : memref<8x32xbf16, #tpu.memory_space<vmem>>, vector<8x32xbf16>
    %c0_1 = arith.constant 0 : index
    %c0_2 = arith.constant 0 : index
    %1 = vector.load %arg2[%c0_1, %c0_2] : memref<32x128xbf16, #tpu.memory_space<vmem>>, vector<32x128xbf16>
    %cst = arith.constant dense<0.000000e+00> : vector<8x128xf32>
    %2 = tpu.matmul %0, %1, %cst {dimension_numbers = #tpu.dot_dimension_numbers<[1], [0], [0], [1], [0, 0, 1, 1], [], []>} : vector<8x32xbf16>, vector<32x128xbf16>, vector<8x128xf32> -> vector<8x128xf32>
    %c0_3 = arith.constant 0 : index
    %c0_4 = arith.constant 0 : index
    %3 = vector.load %arg3[%c0_3, %c0_4] : memref<1x128xf32, #tpu.memory_space<vmem>>, vector<1x128xf32>
    %4 = vector.broadcast %3 : vector<1x128xf32> to vector<8x128xf32>
    %5 = arith.addf %2, %4 : vector<8x128xf32>
    %6 = math.tanh %5 : vector<8x128xf32>
    %7 = arith.truncf %6 : vector<8x128xf32> to vector<8x128xbf16>
    %c0_5 = arith.constant 0 : index
    %c0_6 = arith.constant 0 : index
    %8 = vector.load %arg4[%c0_5, %c0_6] : memref<128x128xbf16, #tpu.memory_space<vmem>>, vector<128x128xbf16>
    %cst_7 = arith.constant dense<0.000000e+00> : vector<8x128xf32>
    %9 = tpu.matmul %7, %8, %cst_7 {dimension_numbers = #tpu.dot_dimension_numbers<[1], [0], [0], [1], [0, 0, 1, 1], [], []>} : vector<8x128xbf16>, vector<128x128xbf16>, vector<8x128xf32> -> vector<8x128xf32>
    %c0_8 = arith.constant 0 : index
    %c0_9 = arith.constant 0 : index
    %10 = vector.load %arg5[%c0_8, %c0_9] : memref<1x128xf32, #tpu.memory_space<vmem>>, vector<1x128xf32>
    %11 = vector.broadcast %10 : vector<1x128xf32> to vector<8x128xf32>
    %12 = arith.addf %9, %11 : vector<8x128xf32>
    %c0_10 = arith.constant 0 : index
    %c0_11 = arith.constant 0 : index
    %13 = vector.load %arg6[%c0_10, %c0_11] : memref<8x128xf32, #tpu.memory_space<vmem>>, vector<8x128xf32>
    tpu.vector_store %arg6[%c0_10, %c0_11], %12 {strides = array<i32>} : memref<8x128xf32, #tpu.memory_space<vmem>>, vector<8x128xf32>,
    return
  }
  func.func @transform_0(%arg0: i32) -> (i32, i32) {
    %c0_i32 = arith.constant 0 : i32
    %c0_i32_0 = arith.constant 0 : i32
    return %arg0, %c0_i32 : i32, i32
  }
  func.func @transform_1(%arg0: i32) -> (i32, i32) {
    %c0_i32 = arith.constant 0 : i32
    %c0_i32_0 = arith.constant 0 : i32
    %c0_i32_1 = arith.constant 0 : i32
    return %c0_i32, %c0_i32_0 : i32, i32
  }
  func.func @transform_2(%arg0: i32) -> (i32, i32) {
    %c0_i32 = arith.constant 0 : i32
    %c0_i32_0 = arith.constant 0 : i32
    %c0_i32_1 = arith.constant 0 : i32
    return %c0_i32, %c0_i32_0 : i32, i32
  }
  func.func @transform_3(%arg0: i32) -> (i32, i32) {
    %c0_i32 = arith.constant 0 : i32
    %c0_i32_0 = arith.constant 0 : i32
    %c0_i32_1 = arith.constant 0 : i32
    return %c0_i32, %c0_i32_0 : i32, i32
  }
  func.func @transform_4(%arg0: i32) -> (i32, i32) {
    %c0_i32 = arith.constant 0 : i32
    %c0_i32_0 = arith.constant 0 : i32
    %c0_i32_1 = arith.constant 0 : i32
    return %c0_i32, %c0_i32_0 : i32, i32
  }
  func.func @transform_5(%arg0: i32) -> (i32, i32) {
    %c0_i32 = arith.constant 0 : i32
    %c0_i32_0 = arith.constant 0 : i32
    return %arg0, %c0_i32 : i32, i32
  }
}

</mosaic_0001>

<bundles_post_ra>
// kernel: tpu_custom_call.1
= control target key start
LH: loop header
LB: loop body
LE: loop exit
PB: predicated region body
PF: predicated region fallthrough
CT: control target
= control target key end

     0   :  { %10 = vsyncpa [#allocation3], 0  ;;  %s424_s0 = inlined_call_operand.hbm [shape: bf16[8,32], index: 0, kind: input, shape index: {}]   ;;  %s425_s1 = inlined_call_operand.hbm [shape: bf16[32,128], index: 1, kind: input, shape index: {}]   ;;  %s426_s2 = inlined_call_operand.vmem [shape: f32[1,128], index: 2, kind: input, shape index: {}]   ;;  %s427_s3 = inlined_call_operand.hbm [shape: bf16[128,128], index: 3, kind: input, shape index: {}]   ;;  %s428_s4 = inlined_call_operand.vmem [shape: f32[1,128], index: 4, kind: input, shape index: {}]   ;;  %s429_s5 = inlined_call_operand.hbm [shape: f32[8,128], index: 5, kind: output, shape index: {}]  }
   0x1   :  { %11 = vsyncpa [#allocation6], 0  ;;  %s28_s20 = sshll.u32 %s425_s1, 4  ;;  %s29_s20 = int_to_ptr.hbm [resolvable:$true] %s28_s20 }
   0x2   :  { %12 = vsyncpa [#allocation4], 0  ;;  %s370_s21 = smov [#allocation5]   ;;  %s18_s25 = sshll.u32 %s424_s0, 4  ;;  %s19_s25 = int_to_ptr.hbm [resolvable:$true] %s18_s25 }
   0x3   :  { %s30_s22 = sshll.u32 %s370_s21, 4  ;;  %s371_s26 = smov 64   ;;  %s31_s22 = int_to_ptr.vmem [resolvable:$true] %s30_s22 }
   0x4   :  { %s372_s27 = smov 4   ;;  %s373_s28 = smov [#allocation2]  }
   0x5   :  { %36 = dma.hbm_to_vmem [thread:$0]  %s29_s20, 256, %s31_s22, [#allocation6], %s371_s26, %s371_s26, %s372_s27  }
   0x6   :  { %s20_s29 = sshll.u32 %s373_s28, 4  ;;  %s43_s7 = sshll.u32 %s427_s3, 4  ;;  %s21_s29 = int_to_ptr.vmem [resolvable:$true] %s20_s29  ;;  %s44_s7 = int_to_ptr.hbm [resolvable:$true] %s43_s7 }
   0x7   :  { %23 = dma.hbm_to_vmem [thread:$0]  %s19_s25, 64, %s21_s29, [#allocation3]  }
   0x8   :  { %s374_s1 = smov [#allocation7]  }
   0x9   :  { %s45_s8 = sshll.u32 %s374_s1, 4  ;;  %s46_s8 = int_to_ptr.vmem [resolvable:$true] %s45_s8 }
   0xa   :  { %51 = dma.hbm_to_vmem [thread:$0]  %s44_s7, 1024, %s46_s8, [#allocation6], %s371_s26, %s371_s26, %s372_s27  }
   0xb   :  { %364 = dma.done.wait [#allocation3], 64  }
   0xc   :  { %365 = vsyncadd [#allocation3], 4294967232 }
   0xd   :  { %366 = dma.done.wait [#allocation6], 1280  }
   0xe   :  { %367 = vsyncadd [#allocation6], 4294966016  ;;  %v249_v0 = vld [vmem:[#allocation5 + $0x8] sm:$0xff]  ;;  %v248_v2 = vld [vmem:[#allocation5] sm:$0xff]  ;;  %vm88_vm0 = vcmask 261120   ;;  %s375_s11 = smov [#allocation8]  }
   0xf   :  { %v257_v1 = vld [vmem:[#allocation7 + $0x38] sm:$0xff]  ;;  %98 = vmatpush.bf16.msra.mxu0 %v249_v0  ;;  %v256_v3 = vld [vmem:[#allocation7 + $0x30] sm:$0xff]  ;;  %v67_v4 = vld [vmem:[#allocation2] sm:$0xf]  ;;  %s194_s12 = sshll.u32 %s375_s11, 4  ;;  %s196_s15 = sshll.u32 %s429_s5, 4  ;;  %s195_s12 = int_to_ptr.vmem [resolvable:$true] %s194_s12  ;;  %s197_s15 = int_to_ptr.hbm [resolvable:$true] %s196_s15 }
  0x10   :  { %175 = vmatpush.bf16.msra.mxu1 %v257_v1  ;;  %v255_v5 = vld [vmem:[#allocation7 + $0x28] sm:$0xff]  ;;  %v254_v6 = vld [vmem:[#allocation7 + $0x20] sm:$0xff]  ;;  %v253_v7 = vld [vmem:[#allocation7 + $0x18] sm:$0xff] }
  0x11   :  { %v252_v8 = vld [vmem:[#allocation7 + $0x10] sm:$0xff]  ;;  %v251_v9 = vld [vmem:[#allocation7 + $0x8] sm:$0xff]  ;;  %v250_v10 = vld [vmem:[#allocation7] sm:$0xff] }
  0x12   :  { %v264_v11 = vld [vmem:[%s426_s2] ss:$0 sm:$0xff] }
  0x13   :  { %99 = vmatpush.bf16.msra.mxu0 %v248_v2  ;;  %v265_v17 = vld [vmem:[%s428_s4] ss:$0 sm:$0xff] }
  0x14   :  { %176 = vmatpush.bf16.msra.mxu1 %v256_v3 }
  0x16   :  { %215 = vmatmul.msk.bf16.vlgmr.msra.gmra.mxu0 %vm88_vm0, %v67_v4 }
  0x18   :  { %177 = vmatpush.bf16.msra.mxu1 %v255_v5 }
  0x1c   :  { %178 = vmatpush.bf16.msra.mxu1 %v254_v6 }
  0x20   :  { %179 = vmatpush.bf16.msra.mxu1 %v253_v7 }
  0x24   :  { %180 = vmatpush.bf16.msra.mxu1 %v252_v8 }
  0x28   :  { %181 = vmatpush.bf16.msra.mxu1 %v251_v9 }
  0x2c   :  { %182 = vmatpush.bf16.msra.mxu1 %v250_v10 }
  0x93   :  { %v101_v12 = vpop.f32.mrf.mxu0 }
  0x94   :  { %v102_v13 = vadd.f32 %v264_v11, %v101_v12 }
  0x96   :  { %266 = vtanh.f32 %v102_v13 }
  0x9b   :  { %v103_v14 = vpop.f32.mrf.mxu0 }
  0x9c   :  { %v267_v15 = vpop.eup %266 }
  0x9d   :  { %v106_v16 = vpack.c.bf16 %v267_v15, %v267_v15 }
  0x9f   :  { %183 = vmatmul.bf16.vlgmr.msra.gmra.mxu1 %v106_v16 }
 0x11c   :  { %v184_v18 = vpop.f32.mrf.mxu1 }
 0x11d   :  { %v185_v19 = vadd.f32 %v265_v17, %v184_v18 }
 0x11f   :  { %188 = vst [vmem:[#allocation8] sm:$0xff] %v185_v19 }
 0x120   :  { %199 = dma.vmem_to_hbm [thread:$0]  %s195_s12, 128, %s197_s15, [#allocation4]  }
 0x124   :  { %v186_v20 = vpop.f32.mrf.mxu1 }
 0x125   :  { %368 = dma.done.wait [#allocation4], 128  }
 0x126   :  { %369 = vsyncadd [#allocation4], 4294967168 }
 0x127   :  { %204 = vsyncpa [#allocation3], 1 }
 0x128   :  { %205 = vsyncpa [#allocation6], 1 }
 0x129   :  { %206 = vsyncpa [#allocation4], 1 }

</bundles_post_ra>
